<compile_context>
chip_gen: v6e
topology: v6e:2x2x1
jax: 0.10.0
libtpu: 0.0.40
codegen_flags: <defaults>
</compile_context>

<pallas_src>
import functools

import jax
import jax.numpy as jnp
from jax.experimental import pallas as pl
from jax.experimental.pallas import tpu as pltpu


def _binarize_kernel(true_f, x_ref, o_ref):
    # x_ref / o_ref: (TN, F_pad) tile in VMEM.
    x = x_ref[...]
    # Per-row sum accumulated in f32; divide by the TRUE feature count so any
    # zero padding along the lane axis does not shift the mean.
    row_sum = jnp.sum(x, axis=-1, keepdims=True, dtype=jnp.float32)
    mean = (row_sum * (1.0 / true_f)).astype(x.dtype)
    # Compare in native width; bool -> 0.0 / 1.0 in the output dtype.
    o_ref[...] = (x >= mean).astype(o_ref.dtype)


def _round_up(v, m):
    return ((v + m - 1) // m) * m


def binarized_module(x):
    """Equivalent of BinarizedModule()(x) for an NCHW float tensor."""
    n = x.shape[0]
    x2d = x.reshape(n, -1)  # (N, F)  F = C*H*W
    f = x2d.shape[1]
    itemsize = jnp.dtype(x2d.dtype).itemsize

    # Lane-dense feature dim (multiple of 128) -> unmasked full-lane stores.
    f_pad = _round_up(f, 128)

    # Sublane multiple for the dtype (8 for f32, 16 for bf16, 32 for int8).
    sub = max(8, 32 // itemsize)

    # Size TN from a conservative VMEM budget: double-buffered input + output
    # is 4 * TN * F_pad * itemsize bytes.  Target <= ~12 MiB total so it fits
    # v5e's 16 MiB default scoped VMEM and leaves headroom on v6e/v7x.
    vmem_budget = 12 * 1024 * 1024
    bytes_per_row = 4 * f_pad * itemsize
    tn = max(sub, (vmem_budget // bytes_per_row) // sub * sub)
    tn = min(tn, 512)                       # per-step overhead already amortized
    tn = min(tn, _round_up(n, sub))         # don't over-pad tiny batches
    tn = max(sub, (tn // sub) * sub)

    n_pad = _round_up(n, tn)

    if (n_pad != n) or (f_pad != f):
        x2d_p = jnp.zeros((n_pad, f_pad), dtype=x2d.dtype).at[:n, :f].set(x2d)
    else:
        x2d_p = x2d

    kernel = functools.partial(_binarize_kernel, float(f))

    out2d = pl.pallas_call(
        kernel,
        out_shape=jax.ShapeDtypeStruct((n_pad, f_pad), x2d.dtype),
        grid=(n_pad // tn,),
        in_specs=[pl.BlockSpec((tn, f_pad), lambda i: (i, 0))],
        out_specs=pl.BlockSpec((tn, f_pad), lambda i: (i, 0)),
        compiler_params=pltpu.CompilerParams(
            dimension_semantics=("parallel",),
            vmem_limit_bytes=32 * 1024 * 1024,
        ),
    )(x2d_p)

    return out2d[:n, :f].reshape(x.shape)


if __name__ == "__main__":
    key = jax.random.PRNGKey(0)
    # Small NCHW input consistent with the module's usage: batch=2, C=4, H=W=16.
    x = jax.random.normal(key, (2, 4, 16, 16), dtype=jnp.float32)

    out = binarized_module(x)
    out = jax.block_until_ready(out)

    # Reference check in plain JAX (same semantics as the PyTorch loop).
    x2d = x.reshape(x.shape[0], -1)
    ref = jnp.where(x2d >= jnp.mean(x2d, axis=-1, keepdims=True), 1.0, 0.0)
    ref = ref.reshape(x.shape)
    assert out.shape == x.shape and out.dtype == x.dtype
    assert bool(jnp.all(out == ref))

    print("KERNEL_OK")
</pallas_src>

<mosaic_0001>
module attributes {stable_mosaic.version = 11 : i64} {
  func.func @_binarize_kernel(%arg0: i32, %arg1: memref<8x1024xf32, #tpu.memory_space<vmem>>, %arg2: memref<8x1024xf32, #tpu.memory_space<vmem>>) attributes {dimension_semantics = [#tpu.dimension_semantics<parallel>], iteration_bounds = array<i64: 1>, scalar_prefetch = 0 : i64, scratch_operands = 0 : i64, tpu.core_type = #tpu.core_type<tc>, window_params = [{transform_indices = @transform_0, window_bounds = array<i64: 8, 1024>}, {transform_indices = @transform_1, window_bounds = array<i64: 8, 1024>}]} {
    %c0 = arith.constant 0 : index
    %c0_0 = arith.constant 0 : index
    %0 = vector.load %arg1[%c0, %c0_0] : memref<8x1024xf32, #tpu.memory_space<vmem>>, vector<8x1024xf32>
    %cst = arith.constant dense<0.000000e+00> : vector<8xf32>
    %1 = vector.multi_reduction <add>, %0, %cst [1] : vector<8x1024xf32> to vector<8xf32>
    %2 = vector.shape_cast %1 : vector<8xf32> to vector<8x1xf32>
    %cst_1 = arith.constant 9.765625E-4 : f32
    %3 = vector.broadcast %cst_1 : f32 to vector<8x1xf32>
    %4 = arith.mulf %2, %3 : vector<8x1xf32>
    %5 = vector.broadcast %4 : vector<8x1xf32> to vector<8x1024xf32>
    %6 = arith.cmpf oge, %0, %5 : vector<8x1024xf32>
    %7 = arith.extui %6 : vector<8x1024xi1> to vector<8x1024xi32>
    %8 = arith.sitofp %7 : vector<8x1024xi32> to vector<8x1024xf32>
    %c0_2 = arith.constant 0 : index
    %c0_3 = arith.constant 0 : index
    %9 = vector.load %arg2[%c0_2, %c0_3] : memref<8x1024xf32, #tpu.memory_space<vmem>>, vector<8x1024xf32>
    tpu.vector_store %arg2[%c0_2, %c0_3], %8 {strides = array<i32>} : memref<8x1024xf32, #tpu.memory_space<vmem>>, vector<8x1024xf32>,
    return
  }
  func.func @transform_0(%arg0: i32) -> (i32, i32) {
    %c0_i32 = arith.constant 0 : i32
    %c0_i32_0 = arith.constant 0 : i32
    return %arg0, %c0_i32 : i32, i32
  }
  func.func @transform_1(%arg0: i32) -> (i32, i32) {
    %c0_i32 = arith.constant 0 : i32
    %c0_i32_0 = arith.constant 0 : i32
    return %arg0, %c0_i32 : i32, i32
  }
}

</mosaic_0001>

<bundles_post_ra>
// kernel: tpu_custom_call.1
= control target key start
LH: loop header
LB: loop body
LE: loop exit
PB: predicated region body
PF: predicated region fallthrough
CT: control target
= control target key end

     0   :  { %6 = vsyncpa [#allocation3], 0  ;;  %s160_s0 = inlined_call_operand.hbm [shape: f32[8,1024], index: 0, kind: input, shape index: {}]   ;;  %s161_s1 = inlined_call_operand.hbm [shape: f32[8,1024], index: 1, kind: output, shape index: {}]  }
   0x1   :  { %7 = vsyncpa [#allocation4], 0  ;;  %s141_s6 = smov [#allocation2]  }
   0x2   :  { %s14_s7 = sshll.u32 %s141_s6, 4  ;;  %s15_s7 = int_to_ptr.vmem [resolvable:$true] %s14_s7 }
   0x3   :  { %s105_s8 = scalar_lea.vmem %s15_s7, 1024  ;;  %p110_p1 = scmp.lt.s32.totalorder %s15_s7, %s15_s7 }
   0x4   :  { %p106_p0 = scmp.ne.s32.totalorder %s15_s7, %s105_s8  ;;  %p111_p2 = scmp.lt.s32.totalorder %s105_s8, %s105_s8 }
   0x6   :  { %p112_p3 = por %p111_p2, %p110_p1 }
   0x8   :  { %p113_p4 = pnand %p112_p3, %p106_p0 }
   0xa   :  { %116 = shalt.err (!%p113_p4)
}
   0xb   :  { %17 = dma.hbm_to_vmem [thread:$0]  %s160_s0, 1024, %s15_s7, [#allocation3]  }
   0xc   :  { %137 = dma.done.wait [#allocation3], 1024  }
   0xd   :  { %138 = vsyncadd [#allocation3], 4294966272  ;;  %v21_v0 = vld [vmem:[#allocation2] sm:$0xff]  ;;  %v22_v1 = vld [vmem:[#allocation2 + $0x8] sm:$0xff]  ;;  %s142_s0 = smov [#allocation5]   ;;  %v143_v17 = vmov 0.0  }
   0xe   :  { %v23_v2 = vld [vmem:[#allocation2 + $0x10] sm:$0xff]  ;;  %v29_v3 = vadd.f32 %v22_v1, %v21_v0  ;;  %v24_v4 = vld [vmem:[#allocation2 + $0x18] sm:$0xff]  ;;  %v25_v6 = vld [vmem:[#allocation2 + $0x20] sm:$0xff]  ;;  %s77_s11 = sshll.u32 %s142_s0, 4  ;;  %s78_s11 = int_to_ptr.vmem [resolvable:$true] %s77_s11 }
   0xf   :  { %v26_v8 = vld [vmem:[#allocation2 + $0x28] sm:$0xff]  ;;  %v27_v10 = vld [vmem:[#allocation2 + $0x30] sm:$0xff]  ;;  %v28_v12 = vld [vmem:[#allocation2 + $0x38] sm:$0xff]  ;;  %s117_s12 = scalar_lea.vmem %s78_s11, 1024  ;;  %p122_p6 = scmp.lt.s32.totalorder %s78_s11, %s78_s11 }
  0x10   :  { %v30_v5 = vadd.f32 %v29_v3, %v23_v2  ;;  %p118_p5 = scmp.ne.s32.totalorder %s78_s11, %s117_s12  ;;  %p123_p7 = scmp.lt.s32.totalorder %s117_s12, %s117_s12 }
  0x12   :  { %v31_v7 = vadd.f32 %v30_v5, %v24_v4  ;;  %p124_p8 = por %p123_p7, %p122_p6 }
  0x14   :  { %v32_v9 = vadd.f32 %v31_v7, %v25_v6  ;;  %p125_p9 = pnand %p124_p8, %p118_p5 }
  0x16   :  { %v33_v11 = vadd.f32 %v32_v9, %v26_v8 }
  0x18   :  { %v34_v13 = vadd.f32 %v33_v11, %v27_v10 }
  0x1a   :  { %v35_v14 = vadd.f32 %v34_v13, %v28_v12 }
  0x1c   :  { %36 = vadd.xlane.f32.xlu0 %v35_v14 }
  0xa5   :  { %v37_v15 = vpop.xlane.xlu0 %36 }
  0xa6   :  { %v38_v16 = vmul.f32 0.0009765625, %v37_v15 }
  0xa8   :  { %vm39_vm0 = vcmp.ge.f32.partialorder %v21_v0, %v38_v16  ;;  %vm40_vm1 = vcmp.ge.f32.partialorder %v22_v1, %v38_v16  ;;  %vm41_vm2 = vcmp.ge.f32.partialorder %v23_v2, %v38_v16  ;;  %vm42_vm3 = vcmp.ge.f32.partialorder %v24_v4, %v38_v16 }
  0xa9   :  { %vm43_vm4 = vcmp.ge.f32.partialorder %v25_v6, %v38_v16  ;;  %vm44_vm5 = vcmp.ge.f32.partialorder %v26_v8, %v38_v16  ;;  %vm45_vm6 = vcmp.ge.f32.partialorder %v27_v10, %v38_v16  ;;  %vm46_vm7 = vcmp.ge.f32.partialorder %v28_v12, %v38_v16 }
  0xaa   :  { %v86_v18 = vsel %vm39_vm0, 1.0, %v143_v17  ;;  %v87_v19 = vsel %vm40_vm1, 1.0, %v143_v17  ;;  %v88_v20 = vsel %vm41_vm2, 1.0, %v143_v17  ;;  %v89_v21 = vsel %vm42_vm3, 1.0, %v143_v17 }
  0xab   :  { %v90_v22 = vsel %vm43_vm4, 1.0, %v143_v17  ;;  %v91_v23 = vsel %vm44_vm5, 1.0, %v143_v17  ;;  %v92_v24 = vsel %vm45_vm6, 1.0, %v143_v17  ;;  %v93_v25 = vsel %vm46_vm7, 1.0, %v143_v17  ;;  %63 = vst [vmem:[#allocation5] sm:$0xff] %v86_v18  ;;  %64 = vst [vmem:[#allocation5 + $0x8] sm:$0xff] %v87_v19 }
  0xac   :  { %65 = vst [vmem:[#allocation5 + $0x10] sm:$0xff] %v88_v20  ;;  %66 = vst [vmem:[#allocation5 + $0x18] sm:$0xff] %v89_v21 }
  0xad   :  { %67 = vst [vmem:[#allocation5 + $0x20] sm:$0xff] %v90_v22  ;;  %68 = vst [vmem:[#allocation5 + $0x28] sm:$0xff] %v91_v23 }
  0xae   :  { %69 = vst [vmem:[#allocation5 + $0x30] sm:$0xff] %v92_v24  ;;  %70 = vst [vmem:[#allocation5 + $0x38] sm:$0xff] %v93_v25 }
  0xaf   :  { %128 = shalt.err (!%p125_p9)
}
  0xb0   :  { %80 = dma.vmem_to_hbm [thread:$0]  %s78_s11, 1024, %s161_s1, [#allocation4]  }
  0xb1   :  { %139 = dma.done.wait [#allocation4], 1024  }
  0xb2   :  { %140 = vsyncadd [#allocation4], 4294966272 }
  0xb3   :  { %84 = vsyncpa [#allocation3], 1 }
  0xb4   :  { %85 = vsyncpa [#allocation4], 1 }

</bundles_post_ra>
